<compile_context>
chip_gen: v5e
topology: v5e:2x2
jax: 0.10.0
libtpu: 0.0.40
codegen_flags: <defaults>
</compile_context>

<pallas_src>
import math
import functools

import jax
import jax.numpy as jnp
import numpy as np
from jax.experimental import pallas as pl
from jax.experimental.pallas import tpu as pltpu


def _resnet_tanh_kernel(x_ref, w_ref, b_ref, wout_ref, o_ref):
    """One batch tile, feature-major.  x_ref: (dim, tb); o_ref: (1, tb)."""
    dim, tb = x_ref.shape
    m = w_ref.shape[1]

    xt = x_ref[...].astype(jnp.float32)                        # (dim, tb)
    # s = Ix^T @ x == input coords zero-padded to m features.  Built once; the
    # full (m, tb) form is needed for the first residual add anyway, and
    # feeding it to layer 0 is free on the MXU (contraction pads to 128
    # either way, and fc1's weight columns beyond `dim` are zero).
    s = jnp.concatenate(
        [xt, jnp.zeros((m - dim, tb), jnp.float32)], axis=0)   # (m, tb)

    w_dt = w_ref.dtype  # f32 default; bf16 params are an opt-in (v6e/v7x MXU)

    def layer(l, act):
        w = w_ref[l]                                           # (m, m) static
        b = b_ref[:, l:l + 1].astype(jnp.float32)              # (m, 1)
        z = jnp.dot(w, act.astype(w_dt),
                    preferred_element_type=jnp.float32) + b
        # jnp.tanh lowers to the native EUP tanh push on TPU (its own VLIW
        # slot, off the VPU path) -- keep it, do not decompose into exp/div.
        return jnp.tanh(z)

    # block 1 (fc1 weight is zero-padded along its input dim, so
    # layer(0, s) == fc1(x) because s's padded rows are zero)
    y = layer(0, s)
    y = layer(1, y) + s
    s = y
    # block 2
    y = layer(2, y)
    y = layer(3, y) + s
    s = y
    # block 3
    y = layer(4, y)
    y = layer(5, y) + s

    # out layer (no bias): (1, m) @ (m, tb) -> (1, tb), lane-dense store.
    o_ref[...] = jnp.dot(wout_ref[...], y.astype(w_dt),
                         preferred_element_type=jnp.float32
                         ).astype(o_ref.dtype)


def init_params(key, m, dim=2, dtype=jnp.float32):
    """PyTorch-like nn.Linear init; weights PyTorch-native (out, in), packed."""
    assert dim == 2, "module hard-codes Ix[0,0]=Ix[1,1]=1 (dim must be 2)"
    keys = jax.random.split(key, 13)
    fan_ins = [dim, m, m, m, m, m]
    Ws, Bs = [], []
    for i, fi in enumerate(fan_ins):
        bound = 1.0 / math.sqrt(fi)
        w = jax.random.uniform(keys[2 * i], (m, fi), dtype,
                               minval=-bound, maxval=bound)
        b = jax.random.uniform(keys[2 * i + 1], (m,), dtype,
                               minval=-bound, maxval=bound)
        if fi != m:                       # zero-pad fc1 weight (m, dim)->(m, m)
            w = jnp.pad(w, ((0, 0), (0, m - fi)))
        Ws.append(w)
        Bs.append(b)
    bound = 1.0 / math.sqrt(m)
    wout = jax.random.uniform(keys[12], (1, m), dtype,
                              minval=-bound, maxval=bound)
    return {"W": jnp.stack(Ws, axis=0),   # (6, m, m)
            "B": jnp.stack(Bs, axis=1),   # (m, 6)
            "wout": wout}                 # (1, m)


# Max lanes per batch tile.  Several live (32, tb) f32 activations (~1 MiB each
# at 8192) plus double-buffered I/O stay well under every generation's scoped
# VMEM default, while the per-tile work (>10x the ~0.35 us grid-step overhead)
# amortizes the fixed cost.
_MAX_TILE_B = 8192


@functools.lru_cache(maxsize=1)
def _num_tensorcores():
    """Best-effort TensorCores-per-chip (v7x = 2, v5e/v6e = 1)."""
    try:
        info = pltpu.get_tpu_info()
        for name in ("num_cores", "num_tensorcores", "tensorcore_count",
                     "cores_per_chip"):
            v = getattr(info, name, None)
            if isinstance(v, int) and 0 < v <= 8:
                return v
    except Exception:
        pass
    try:
        kind = jax.devices()[0].device_kind.lower()
        if "v7" in kind:
            return 2
    except Exception:
        pass
    return 1


def _pick_tile(N, tile_b, num_tc):
    """Lane-dense batch tile (multiple of 128).

    Big enough to amortize the ~0.35 us fixed per-grid-step overhead, but:
      * sized from ceil(N / steps) so padding waste stays < 128 lanes/step,
      * >= num_tc grid steps on multi-TensorCore chips (v7x) so megacore
        sharding keeps both cores busy; single-TC chips (v5e/v6e) get NO
        tile halving (that was pure per-step overhead).
    """
    cap = max(128, min(tile_b, _MAX_TILE_B))
    n_lanes = pl.cdiv(N, 128) * 128           # smallest lane-dense cover of N
    steps = pl.cdiv(n_lanes, cap)
    if num_tc > 1 and N >= 128 * num_tc:
        steps = max(steps, num_tc)
    tb = pl.cdiv(pl.cdiv(n_lanes, steps), 128) * 128
    return max(128, tb)


@functools.partial(jax.jit, static_argnames=("tile_b", "boundary_control_type"))
def resnet_tanh_forward(x, params, *, tile_b=_MAX_TILE_B,
                        boundary_control_type="none"):
    """Pallas-backed ResNet_Tanh forward.  x: (N, 2) float32."""
    N, dim = x.shape
    assert dim == 2, "module hard-codes Ix[0,0]=Ix[1,1]=1 (dim must be 2)"
    W, B, wout = params["W"], params["B"], params["wout"]
    m = W.shape[1]

    tb = _pick_tile(N, tile_b, _num_tensorcores())
    n_pad = pl.cdiv(N, tb) * tb

    # Feature-major (dim, N).  Done inside the same jit so XLA fuses the
    # transpose / f32 cast / pad into a single pass over x before the kernel
    # reads its lane-dense (dim, tb) blocks.
    xT = x.T.astype(jnp.float32)
    if n_pad != N:
        xT = jnp.pad(xT, ((0, 0), (0, n_pad - N)))

    cost = pl.CostEstimate(
        flops=(2 * 6 * m * m + 2 * m) * N,
        transcendentals=6 * m * N,
        bytes_accessed=(dim + 1) * N * 4 + (6 * m * m + 7 * m) * 4,
    )

    out = pl.pallas_call(
        _resnet_tanh_kernel,
        out_shape=jax.ShapeDtypeStruct((1, n_pad), jnp.float32),
        grid_spec=pltpu.PrefetchScalarGridSpec(
            num_scalar_prefetch=0,
            grid=(n_pad // tb,),
            in_specs=[
                pl.BlockSpec((dim, tb), lambda i: (0, i)),     # x tile
                pl.BlockSpec((6, m, m), lambda i: (0, 0, 0)),  # packed weights
                pl.BlockSpec((m, 6), lambda i: (0, 0)),        # packed biases
                pl.BlockSpec((1, m), lambda i: (0, 0)),        # out weight
            ],
            out_specs=pl.BlockSpec((1, tb), lambda i: (0, i)),
        ),
        compiler_params=pltpu.CompilerParams(
            dimension_semantics=("parallel",)),
        cost_estimate=cost,
    )(xT, W, B, wout)

    y = out[0, :N]                                    # == PyTorch y.squeeze(1)

    if boundary_control_type == "none":
        return y
    elif boundary_control_type == "net_u":
        x1, x2 = x[:, 0], x[:, 1]
        # Matches the PyTorch source literally: (x1**2 + x2**2) ** 1 / 2
        # parses as (x1^2 + x2^2) / 2 (likely an upstream bug; kept as-is).
        r = (x1 ** 2 + x2 ** 2) / 2.0
        base = jnp.where(x1 > -0.5, 0.0, 1.0)
        return ((np.pi / 2 - jnp.arctan(-x1 / x2))
                * jnp.sin(np.pi / 2 * r) * y + base)
    elif boundary_control_type == "net_v":
        x1, x2 = x[:, 0], x[:, 1]
        return (-np.pi / 2 - jnp.arctan(-x1 / x2)) * y
    else:
        # TODO(synk): 'cube' (the PyTorch default) falls through every branch
        # of the reference forward() and returns None; mirror that behavior.
        return None


def _reference_forward(x, params):
    """Pure-JAX batch-major reference (boundary type 'none')."""
    W = params["W"].astype(jnp.float32)     # (6, m, m)
    B = params["B"].astype(jnp.float32)     # (m, 6)
    wout = params["wout"].astype(jnp.float32)
    N, dim = x.shape
    m = W.shape[1]
    s = jnp.pad(x, ((0, 0), (0, m - dim)))  # == x @ Ix
    y = jnp.tanh(s @ W[0].T + B[:, 0])
    y = jnp.tanh(y @ W[1].T + B[:, 1]) + s
    s = y
    y = jnp.tanh(y @ W[2].T + B[:, 2])
    y = jnp.tanh(y @ W[3].T + B[:, 3]) + s
    s = y
    y = jnp.tanh(y @ W[4].T + B[:, 4])
    y = jnp.tanh(y @ W[5].T + B[:, 5]) + s
    return (y @ wout.T)[:, 0]


if __name__ == "__main__":
    key = jax.random.PRNGKey(0)
    k_params, k_x = jax.random.split(key)

    dim, m = 2, 32
    params = init_params(k_params, m=m, dim=dim)

    # Lane-aligned batch.
    N = 256
    x = jax.random.uniform(k_x, (N, dim), jnp.float32, minval=-1.0, maxval=1.0)
    out = jax.block_until_ready(
        resnet_tanh_forward(x, params, boundary_control_type="none"))
    ref = _reference_forward(x, params)
    np.testing.assert_allclose(np.asarray(out), np.asarray(ref),
                               rtol=1e-5, atol=1e-5)

    # Non-multiple-of-128 batch exercises the padded-tail path.
    N2 = 200
    x2 = jax.random.uniform(jax.random.PRNGKey(1), (N2, dim), jnp.float32,
                            minval=-1.0, maxval=1.0)
    out2 = jax.block_until_ready(
        resnet_tanh_forward(x2, params, boundary_control_type="none"))
    ref2 = _reference_forward(x2, params)
    np.testing.assert_allclose(np.asarray(out2), np.asarray(ref2),
                               rtol=1e-5, atol=1e-5)

    print("KERNEL_OK")
</pallas_src>

<mosaic_0001>
module attributes {stable_mosaic.version = 11 : i64} {
  func.func @_resnet_tanh_kernel(%arg0: i32, %arg1: memref<2x256xf32, #tpu.memory_space<vmem>>, %arg2: memref<6x32x32xf32, #tpu.memory_space<vmem>>, %arg3: memref<32x6xf32, #tpu.memory_space<vmem>>, %arg4: memref<1x32xf32, #tpu.memory_space<vmem>>, %arg5: memref<1x256xf32, #tpu.memory_space<vmem>>) attributes {dimension_semantics = [#tpu.dimension_semantics<parallel>], iteration_bounds = array<i64: 1>, scalar_prefetch = 0 : i64, scratch_operands = 0 : i64, tpu.core_type = #tpu.core_type<tc>, window_params = [{transform_indices = @transform_0, window_bounds = array<i64: 2, 256>}, {pipeline_mode = #tpu.pipeline_mode<synchronous>, transform_indices = @transform_1, window_bounds = array<i64: 6, 32, 32>}, {pipeline_mode = #tpu.pipeline_mode<synchronous>, transform_indices = @transform_2, window_bounds = array<i64: 32, 6>}, {pipeline_mode = #tpu.pipeline_mode<synchronous>, transform_indices = @transform_3, window_bounds = array<i64: 1, 32>}, {transform_indices = @transform_4, window_bounds = array<i64: 1, 256>}]} {
    %c0 = arith.constant 0 : index
    %c0_0 = arith.constant 0 : index
    %0 = vector.load %arg1[%c0, %c0_0] : memref<2x256xf32, #tpu.memory_space<vmem>>, vector<2x256xf32>
    %cst = arith.constant 0.000000e+00 : f32
    %1 = vector.broadcast %cst : f32 to vector<30x256xf32>
    %2 = tpu.concatenate %0, %1 in 0 : vector<2x256xf32>, vector<30x256xf32> -> vector<32x256xf32>
    %c0_1 = arith.constant 0 : index
    %c0_2 = arith.constant 0 : index
    %c0_3 = arith.constant 0 : index
    %3 = vector.load %arg2[%c0_1, %c0_2, %c0_3] : memref<6x32x32xf32, #tpu.memory_space<vmem>>, vector<1x32x32xf32>
    %4 = vector.shape_cast %3 : vector<1x32x32xf32> to vector<32x32xf32>
    %c0_4 = arith.constant 0 : index
    %c0_5 = arith.constant 0 : index
    %5 = vector.load %arg3[%c0_4, %c0_5] : memref<32x6xf32, #tpu.memory_space<vmem>>, vector<32x1xf32>
    %cst_6 = arith.constant dense<0.000000e+00> : vector<32x256xf32>
    %6 = tpu.matmul %4, %2, %cst_6 {dimension_numbers = #tpu.dot_dimension_numbers<[1], [0], [0], [1], [0, 0, 1, 1], [], []>} : vector<32x32xf32>, vector<32x256xf32>, vector<32x256xf32> -> vector<32x256xf32>
    %7 = vector.broadcast %5 : vector<32x1xf32> to vector<32x256xf32>
    %8 = arith.addf %6, %7 : vector<32x256xf32>
    %9 = math.tanh %8 : vector<32x256xf32>
    %c1 = arith.constant 1 : index
    %c0_7 = arith.constant 0 : index
    %c0_8 = arith.constant 0 : index
    %10 = vector.load %arg2[%c1, %c0_7, %c0_8] : memref<6x32x32xf32, #tpu.memory_space<vmem>>, vector<1x32x32xf32>
    %11 = vector.shape_cast %10 : vector<1x32x32xf32> to vector<32x32xf32>
    %c0_9 = arith.constant 0 : index
    %c1_10 = arith.constant 1 : index
    %12 = vector.load %arg3[%c0_9, %c1_10] : memref<32x6xf32, #tpu.memory_space<vmem>>, vector<32x1xf32>
    %cst_11 = arith.constant dense<0.000000e+00> : vector<32x256xf32>
    %13 = tpu.matmul %11, %9, %cst_11 {dimension_numbers = #tpu.dot_dimension_numbers<[1], [0], [0], [1], [0, 0, 1, 1], [], []>} : vector<32x32xf32>, vector<32x256xf32>, vector<32x256xf32> -> vector<32x256xf32>
    %14 = vector.broadcast %12 : vector<32x1xf32> to vector<32x256xf32>
    %15 = arith.addf %13, %14 : vector<32x256xf32>
    %16 = math.tanh %15 : vector<32x256xf32>
    %17 = arith.addf %16, %2 : vector<32x256xf32>
    %c2 = arith.constant 2 : index
    %c0_12 = arith.constant 0 : index
    %c0_13 = arith.constant 0 : index
    %18 = vector.load %arg2[%c2, %c0_12, %c0_13] : memref<6x32x32xf32, #tpu.memory_space<vmem>>, vector<1x32x32xf32>
    %19 = vector.shape_cast %18 : vector<1x32x32xf32> to vector<32x32xf32>
    %c0_14 = arith.constant 0 : index
    %c2_15 = arith.constant 2 : index
    %20 = vector.load %arg3[%c0_14, %c2_15] : memref<32x6xf32, #tpu.memory_space<vmem>>, vector<32x1xf32>
    %cst_16 = arith.constant dense<0.000000e+00> : vector<32x256xf32>
    %21 = tpu.matmul %19, %17, %cst_16 {dimension_numbers = #tpu.dot_dimension_numbers<[1], [0], [0], [1], [0, 0, 1, 1], [], []>} : vector<32x32xf32>, vector<32x256xf32>, vector<32x256xf32> -> vector<32x256xf32>
    %22 = vector.broadcast %20 : vector<32x1xf32> to vector<32x256xf32>
    %23 = arith.addf %21, %22 : vector<32x256xf32>
    %24 = math.tanh %23 : vector<32x256xf32>
    %c3 = arith.constant 3 : index
    %c0_17 = arith.constant 0 : index
    %c0_18 = arith.constant 0 : index
    %25 = vector.load %arg2[%c3, %c0_17, %c0_18] : memref<6x32x32xf32, #tpu.memory_space<vmem>>, vector<1x32x32xf32>
    %26 = vector.shape_cast %25 : vector<1x32x32xf32> to vector<32x32xf32>
    %c0_19 = arith.constant 0 : index
    %c3_20 = arith.constant 3 : index
    %27 = vector.load %arg3[%c0_19, %c3_20] : memref<32x6xf32, #tpu.memory_space<vmem>>, vector<32x1xf32>
    %cst_21 = arith.constant dense<0.000000e+00> : vector<32x256xf32>
    %28 = tpu.matmul %26, %24, %cst_21 {dimension_numbers = #tpu.dot_dimension_numbers<[1], [0], [0], [1], [0, 0, 1, 1], [], []>} : vector<32x32xf32>, vector<32x256xf32>, vector<32x256xf32> -> vector<32x256xf32>
    %29 = vector.broadcast %27 : vector<32x1xf32> to vector<32x256xf32>
    %30 = arith.addf %28, %29 : vector<32x256xf32>
    %31 = math.tanh %30 : vector<32x256xf32>
    %32 = arith.addf %31, %17 : vector<32x256xf32>
    %c4 = arith.constant 4 : index
    %c0_22 = arith.constant 0 : index
    %c0_23 = arith.constant 0 : index
    %33 = vector.load %arg2[%c4, %c0_22, %c0_23] : memref<6x32x32xf32, #tpu.memory_space<vmem>>, vector<1x32x32xf32>
    %34 = vector.shape_cast %33 : vector<1x32x32xf32> to vector<32x32xf32>
    %c0_24 = arith.constant 0 : index
    %c4_25 = arith.constant 4 : index
    %35 = vector.load %arg3[%c0_24, %c4_25] : memref<32x6xf32, #tpu.memory_space<vmem>>, vector<32x1xf32>
    %cst_26 = arith.constant dense<0.000000e+00> : vector<32x256xf32>
    %36 = tpu.matmul %34, %32, %cst_26 {dimension_numbers = #tpu.dot_dimension_numbers<[1], [0], [0], [1], [0, 0, 1, 1], [], []>} : vector<32x32xf32>, vector<32x256xf32>, vector<32x256xf32> -> vector<32x256xf32>
    %37 = vector.broadcast %35 : vector<32x1xf32> to vector<32x256xf32>
    %38 = arith.addf %36, %37 : vector<32x256xf32>
    %39 = math.tanh %38 : vector<32x256xf32>
    %c5 = arith.constant 5 : index
    %c0_27 = arith.constant 0 : index
    %c0_28 = arith.constant 0 : index
    %40 = vector.load %arg2[%c5, %c0_27, %c0_28] : memref<6x32x32xf32, #tpu.memory_space<vmem>>, vector<1x32x32xf32>
    %41 = vector.shape_cast %40 : vector<1x32x32xf32> to vector<32x32xf32>
    %c0_29 = arith.constant 0 : index
    %c5_30 = arith.constant 5 : index
    %42 = vector.load %arg3[%c0_29, %c5_30] : memref<32x6xf32, #tpu.memory_space<vmem>>, vector<32x1xf32>
    %cst_31 = arith.constant dense<0.000000e+00> : vector<32x256xf32>
    %43 = tpu.matmul %41, %39, %cst_31 {dimension_numbers = #tpu.dot_dimension_numbers<[1], [0], [0], [1], [0, 0, 1, 1], [], []>} : vector<32x32xf32>, vector<32x256xf32>, vector<32x256xf32> -> vector<32x256xf32>
    %44 = vector.broadcast %42 : vector<32x1xf32> to vector<32x256xf32>
    %45 = arith.addf %43, %44 : vector<32x256xf32>
    %46 = math.tanh %45 : vector<32x256xf32>
    %47 = arith.addf %46, %32 : vector<32x256xf32>
    %c0_32 = arith.constant 0 : index
    %c0_33 = arith.constant 0 : index
    %48 = vector.load %arg4[%c0_32, %c0_33] : memref<1x32xf32, #tpu.memory_space<vmem>>, vector<1x32xf32>
    %cst_34 = arith.constant dense<0.000000e+00> : vector<1x256xf32>
    %49 = tpu.matmul %48, %47, %cst_34 {dimension_numbers = #tpu.dot_dimension_numbers<[1], [0], [0], [1], [0, 0, 1, 1], [], []>} : vector<1x32xf32>, vector<32x256xf32>, vector<1x256xf32> -> vector<1x256xf32>
    %c0_35 = arith.constant 0 : index
    %c0_36 = arith.constant 0 : index
    %50 = vector.load %arg5[%c0_35, %c0_36] : memref<1x256xf32, #tpu.memory_space<vmem>>, vector<1x256xf32>
    tpu.vector_store %arg5[%c0_35, %c0_36], %49 {strides = array<i32>} : memref<1x256xf32, #tpu.memory_space<vmem>>, vector<1x256xf32>,
    return
  }
  func.func @transform_0(%arg0: i32) -> (i32, i32) {
    %c0_i32 = arith.constant 0 : i32
    %c0_i32_0 = arith.constant 0 : i32
    return %c0_i32, %arg0 : i32, i32
  }
  func.func @transform_1(%arg0: i32) -> (i32, i32, i32) {
    %c0_i32 = arith.constant 0 : i32
    %c0_i32_0 = arith.constant 0 : i32
    %c0_i32_1 = arith.constant 0 : i32
    %c0_i32_2 = arith.constant 0 : i32
    return %c0_i32, %c0_i32_0, %c0_i32_1 : i32, i32, i32
  }
  func.func @transform_2(%arg0: i32) -> (i32, i32) {
    %c0_i32 = arith.constant 0 : i32
    %c0_i32_0 = arith.constant 0 : i32
    %c0_i32_1 = arith.constant 0 : i32
    return %c0_i32, %c0_i32_0 : i32, i32
  }
  func.func @transform_3(%arg0: i32) -> (i32, i32) {
    %c0_i32 = arith.constant 0 : i32
    %c0_i32_0 = arith.constant 0 : i32
    %c0_i32_1 = arith.constant 0 : i32
    return %c0_i32, %c0_i32_0 : i32, i32
  }
  func.func @transform_4(%arg0: i32) -> (i32, i32) {
    %c0_i32 = arith.constant 0 : i32
    %c0_i32_0 = arith.constant 0 : i32
    return %c0_i32, %arg0 : i32, i32
  }
}

</mosaic_0001>

<bundles_post_ra>
// kernel: resnet_tanh_forward.1
= control target key start
LH: loop header
LB: loop body
LE: loop exit
PB: predicated region body
PF: predicated region fallthrough
CT: control target
= control target key end

     0   :  { %9 = vsyncpa [#allocation3], 0  ;;  %s1179_s0 = inlined_call_operand.vmem [shape: f32[2,256], index: 0, kind: input, shape index: {}]   ;;  %s1180_s1 = inlined_call_operand.hbm [shape: f32[6,32,32], index: 1, kind: input, shape index: {}]   ;;  %s1181_s2 = inlined_call_operand.vmem [shape: f32[32,6], index: 2, kind: input, shape index: {}]   ;;  %s1182_s3 = inlined_call_operand.vmem [shape: f32[1,32], index: 3, kind: input, shape index: {}]   ;;  %s1183_s4 = inlined_call_operand.hbm [shape: f32[1,256], index: 4, kind: output, shape index: {}]  }
   0x1   :  { %10 = vsyncpa [#allocation4], 0  ;;  %s17_s17 = sshll.u32 %s1180_s1, 4  ;;  %s968_s18 = smov [#allocation2]   ;;  %s18_s17 = int_to_ptr.hbm [resolvable:$true] %s17_s17 }
   0x2   :  { %s19_s19 = sshll.u32 %s968_s18, 4  ;;  %s969_s20 = smov 128   ;;  %s20_s19 = int_to_ptr.vmem [resolvable:$true] %s19_s19 }
   0x3   :  { %s970_s21 = smov 8  }
   0x4   :  { %25 = dma.hbm_to_vmem [thread:$0]  %s18_s17, 3072, %s20_s19, [#allocation3], %s969_s20, %s969_s20, %s970_s21  }
   0x5   :  { %964 = dma.done.wait [#allocation3], 3072  }
   0x6   :  { %965 = vsyncadd [#allocation3], 4294964224  ;;  %v971_v0 = vmov 0   ;;  %v34_v1 = vld [vmem:[%s1179_s0] sm:$0xf]  ;;  %v1012_v2 = vld [vmem:[%s1181_s2 + $0x8] sm:$0xff] }
   0x7   :  { %805 = vset.pattern.permute.xlu1 %v971_v0  ;;  %804 = vset.pattern.permute.xlu0 %v971_v0  ;;  %36 = vst [vmem:[#allocation1] ss:$4 sm:$0xff] %v34_v1  ;;  %v1018_v3 = vld [vmem:[%s1181_s2 + $0x18] sm:$0xff]  ;;  %vm41_vm0 = vcmask 1041408   ;;  %v44_v4 = vld [vmem:[#allocation2] sm:$0xff]  ;;  %vm72_vm1 = vcmask 261120  }
   0x8   :  { %59 = vperm.xlu1 %805, %v1012_v2   ;;  %69 = vperm.xlu0 %804, %v1018_v3   ;;  %v1024_v5 = vld [vmem:[%s1181_s2] sm:$0xff]  ;;  %v1029_v6 = vld [vmem:[%s1181_s2 + $0x10] sm:$0xff]  ;;  %v46_v12 = vld [vmem:[#allocation2 + $0x10] sm:$0xff]  ;;  %v972_v22 = vmov 1   ;;  %v973_v55 = vmov 2   ;;  %s977_s5 = smov [#allocation5]  }
   0x9   :  { %v45_v11 = vld [vmem:[#allocation2 + $0x8] sm:$0xff]  ;;  %v47_v13 = vld [vmem:[#allocation2 + $0x18] sm:$0xff]  ;;  %806 = vset.pattern.permute.xlu2 %v972_v22  ;;  %v152_v41 = vld [vmem:[#allocation2 + $0x20] sm:$0xff]  ;;  %s730_s6 = sshll.u32 %s977_s5, 4  ;;  %s732_s9 = sshll.u32 %s1183_s4, 4  ;;  %vm717_vm2 = vcmask 1040384   ;;  %s731_s6 = int_to_ptr.vmem [resolvable:$true] %s730_s6  ;;  %s733_s9 = int_to_ptr.hbm [resolvable:$true] %s732_s9 }
   0xa   :  { %169 = vperm.xlu2 %806, %v1018_v3   ;;  %v153_v44 = vld [vmem:[#allocation2 + $0x28] sm:$0xff]  ;;  %v154_v45 = vld [vmem:[#allocation2 + $0x30] sm:$0xff]  ;;  %v155_v46 = vld [vmem:[#allocation2 + $0x38] sm:$0xff] }
   0xe   :  { %v37_v7 = vld.sshfl [vmem:[#allocation1] sm:$0xff pattern:$0x73625140]  ;;  %v38_v8 = vld.sshfl [vmem:[#allocation1 + $0x8] sm:$0xff pattern:$0x73625140] }
   0xf   :  { %v1031_v9 = vsel %vm41_vm0, %v37_v7, 0.0  ;;  %742 = vmatpush.msk.msra.mxu0 %vm41_vm0, %v37_v7  ;;  %v1033_v10 = vsel %vm41_vm0, %v38_v8, 0.0  ;;  %747 = vmatpush.msk.msra.mxu1 %vm41_vm0, %v38_v8 }
  0x10   :  { %743 = vmatmul.msk.f32.vlgmr.msra.gmra.mxu0 %vm72_vm1, %v44_v4  ;;  %748 = vmatmul.msk.f32.vlgmr.msra.gmra.mxu1 %vm72_vm1, %v44_v4 }
  0x11   :  { %54 = vperm.xlu1 %805, %v1024_v5   ;;  %64 = vperm.xlu0 %804, %v1029_v6  }
  0x12   :  { %165 = vperm.xlu2 %806, %v1029_v6  }
  0x18   :  { %744 = vmatmul.msk.f32.gmra.mxu0 %vm72_vm1, %v45_v11  ;;  %749 = vmatmul.msk.f32.gmra.mxu1 %vm72_vm1, %v45_v11 }
  0x19   :  { %807 = vset.pattern.permute.xlu0 %v972_v22  ;;  %808 = vset.pattern.permute.xlu1 %v972_v22 }
  0x1a   :  { %157 = vperm.xlu0 %807, %v1024_v5   ;;  %161 = vperm.xlu1 %808, %v1012_v2  }
  0x1b   :  { %809 = vset.pattern.permute.xlu2 %v973_v55 }
  0x1c   :  { %276 = vperm.xlu2 %809, %v1018_v3  }
  0x20   :  { %745 = vmatmul.msk.f32.gmra.mxu0 %vm72_vm1, %v46_v12  ;;  %750 = vmatmul.msk.f32.gmra.mxu1 %vm72_vm1, %v46_v12 }
  0x22   :  { %811 = vset.pattern.permute.xlu0 %v973_v55  ;;  %810 = vset.pattern.permute.xlu1 %v973_v55 }
  0x23   :  { %264 = vperm.xlu0 %811, %v1024_v5   ;;  %272 = vperm.xlu1 %810, %v1029_v6  }
  0x24   :  { %268 = vperm.xlu2 %809, %v1012_v2  }
  0x28   :  { %746 = vmatmul.msk.f32.gmra.mxu0 %vm72_vm1, %v47_v13  ;;  %751 = vmatmul.msk.f32.gmra.mxu1 %vm72_vm1, %v47_v13 }
  0x64   :  { %v170_v51 = vpop.permute.xlu2 %169 }
  0x6c   :  { %v166_v58 = vpop.permute.xlu2 %165 }
  0x7a   :  { %v70_v18 = vpop.permute.xlu0 %69  ;;  %v60_v21 = vpop.permute.xlu1 %59 }
  0x83   :  { %v65_v23 = vpop.permute.xlu0 %64  ;;  %v55_v30 = vpop.permute.xlu1 %54 }
  0x8c   :  { %v158_v54 = vpop.permute.xlu0 %157  ;;  %v162_v60 = vpop.permute.xlu1 %161 }
  0x8d   :  { %v102_v14 = vpop.f32.mrf.mxu0  ;;  %v131_v15 = vpop.f32.mrf.mxu1 }
  0x8e   :  { %v103_v33 = vadd.f32 %v102_v14, %v55_v30  ;;  %v132_v34 = vadd.f32 %v131_v15, %v55_v30 }
  0x95   :  { %v105_v16 = vpop.f32.mrf.mxu0  ;;  %v134_v17 = vpop.f32.mrf.mxu1 }
  0x96   :  { %v106_v31 = vadd.f32 %v105_v16, %v60_v21  ;;  %v135_v32 = vadd.f32 %v134_v17, %v60_v21  ;;  %v260_v21 = vld [vmem:[#allocation2 + $0x48] sm:$0xff]  ;;  %v273_v30 = vpop.permute.xlu1 %272 }
  0x9d   :  { %v108_v19 = vpop.f32.mrf.mxu0  ;;  %v137_v20 = vpop.f32.mrf.mxu1 }
  0x9e   :  { %v109_v26 = vadd.f32 %v108_v19, %v65_v23  ;;  %v138_v29 = vadd.f32 %v137_v20, %v65_v23  ;;  %v259_v19 = vld [vmem:[#allocation2 + $0x40] sm:$0xff] }
  0xa5   :  { %v111_v24 = vpop.f32.mrf.mxu0  ;;  %v140_v25 = vpop.f32.mrf.mxu1 }
  0xa6   :  { %v112_v27 = vadd.f32 %v111_v24, %v70_v18  ;;  %v141_v28 = vadd.f32 %v140_v25, %v70_v18 }
  0xa8   :  { %820 = vtanh.f32 %v112_v27 }
  0xa9   :  { %822 = vtanh.f32 %v141_v28 }
  0xaa   :  { %824 = vtanh.f32 %v109_v26  ;;  %v277_v26 = vpop.permute.xlu2 %276 }
  0xab   :  { %826 = vtanh.f32 %v138_v29  ;;  %v974_v29 = vmov 3  }
  0xac   :  { %828 = vtanh.f32 %v106_v31  ;;  %812 = vset.pattern.permute.xlu1 %v974_v29  ;;  %813 = vset.pattern.permute.xlu2 %v974_v29 }
  0xad   :  { %830 = vtanh.f32 %v135_v32  ;;  %375 = vperm.xlu1 %812, %v1018_v3   ;;  %371 = vperm.xlu2 %813, %v1029_v6  }
  0xae   :  { %v821_v35 = vpop.eup %820  ;;  %832 = vtanh.f32 %v103_v33 }
  0xaf   :  { %v823_v36 = vpop.eup %822  ;;  %834 = vtanh.f32 %v132_v34  ;;  %196 = vmatpush.msra.mxu2 %v821_v35 }
  0xb0   :  { %v825_v37 = vpop.eup %824  ;;  %225 = vmatpush.msra.mxu3 %v823_v36 }
  0xb1   :  { %v827_v38 = vpop.eup %826  ;;  %197 = vmatpush.msra.mxu2 %v825_v37 }
  0xb2   :  { %v829_v39 = vpop.eup %828  ;;  %226 = vmatpush.msra.mxu3 %v827_v38  ;;  %v269_v32 = vpop.permute.xlu2 %268 }
  0xb3   :  { %v831_v40 = vpop.eup %830  ;;  %198 = vmatpush.msra.mxu2 %v829_v39  ;;  %v265_v38 = vpop.permute.xlu0 %264 }
  0xb4   :  { %v833_v42 = vpop.eup %832  ;;  %227 = vmatpush.msra.mxu3 %v831_v40 }
  0xb5   :  { %v835_v43 = vpop.eup %834  ;;  %199 = vmatpush.msra.mxu2 %v833_v42  ;;  %367 = vperm.xlu1 %812, %v1012_v2  }
  0xb6   :  { %228 = vmatpush.msra.mxu3 %v835_v43  ;;  %752 = vmatmul.msk.f32.vlgmr.msra.gmra.mxu2 %vm72_vm1, %v152_v41 }
  0xb7   :  { %756 = vmatmul.msk.f32.vlgmr.msra.gmra.mxu3 %vm72_vm1, %v152_v41  ;;  %363 = vperm.xlu2 %813, %v1024_v5  }
  0xbe   :  { %753 = vmatmul.msk.f32.gmra.mxu2 %vm72_vm1, %v153_v44 }
  0xbf   :  { %757 = vmatmul.msk.f32.gmra.mxu3 %vm72_vm1, %v153_v44 }
  0xc6   :  { %754 = vmatmul.msk.f32.gmra.mxu2 %vm72_vm1, %v154_v45 }
  0xc7   :  { %758 = vmatmul.msk.f32.gmra.mxu3 %vm72_vm1, %v154_v45 }
  0xce   :  { %755 = vmatmul.msk.f32.gmra.mxu2 %vm72_vm1, %v155_v46 }
  0xcf   :  { %759 = vmatmul.msk.f32.gmra.mxu3 %vm72_vm1, %v155_v46 }
 0x139   :  { %v201_v47 = vpop.f32.mrf.mxu2 }
 0x13a   :  { %v230_v48 = vpop.f32.mrf.mxu3  ;;  %v202_v56 = vadd.f32 %v201_v47, %v158_v54 }
 0x13b   :  { %v231_v57 = vadd.f32 %v230_v48, %v158_v54  ;;  %v361_v54 = vld [vmem:[#allocation2 + $0x78] sm:$0xff] }
 0x13c   :  { %836 = vtanh.f32 %v202_v56 }
 0x13d   :  { %838 = vtanh.f32 %v231_v57 }
 0x141   :  { %v204_v49 = vpop.f32.mrf.mxu2 }
 0x142   :  { %v233_v50 = vpop.f32.mrf.mxu3  ;;  %v205_v4 = vadd.f32 %v204_v49, %v162_v60  ;;  %v837_v8 = vpop.eup %836  ;;  %v358_v49 = vld [vmem:[#allocation2 + $0x60] sm:$0xff] }
 0x143   :  { %v234_v7 = vadd.f32 %v233_v50, %v162_v60  ;;  %v839_v11 = vpop.eup %838  ;;  %v1079_v18 = vadd.f32 %v837_v8, %v1031_v9  ;;  %v261_v9 = vld [vmem:[#allocation2 + $0x50] sm:$0xff]  ;;  %v975_v60 = vmov 4  }
 0x144   :  { %v1083_v20 = vadd.f32 %v839_v11, %v1033_v10  ;;  %v262_v10 = vld [vmem:[#allocation2 + $0x58] sm:$0xff]  ;;  %815 = vset.pattern.permute.xlu1 %v975_v60  ;;  %814 = vset.pattern.permute.xlu0 %v975_v60 }
 0x145   :  { %478 = vperm.xlu1 %815, %v1029_v6   ;;  %482 = vperm.xlu0 %814, %v1018_v3  }
 0x146   :  { %816 = vset.pattern.permute.xlu2 %v975_v60 }
 0x147   :  { %474 = vperm.xlu2 %816, %v1012_v2  }
 0x149   :  { %v207_v52 = vpop.f32.mrf.mxu2 }
 0x14a   :  { %v236_v53 = vpop.f32.mrf.mxu3  ;;  %v208_v61 = vadd.f32 %v207_v52, %v166_v58  ;;  %v359_v52 = vld [vmem:[#allocation2 + $0x68] sm:$0xff] }
 0x14b   :  { %v237_v0 = vadd.f32 %v236_v53, %v166_v58  ;;  %v360_v53 = vld [vmem:[#allocation2 + $0x70] sm:$0xff] }
 0x14d   :  { %470 = vperm.xlu1 %815, %v1024_v5  }
 0x151   :  { %v210_v59 = vpop.f32.mrf.mxu2 }
 0x152   :  { %v211_v62 = vadd.f32 %v210_v59, %v170_v51  ;;  %v239_v63 = vpop.f32.mrf.mxu3  ;;  %v376_v59 = vpop.permute.xlu1 %375 }
 0x153   :  { %v240_v1 = vadd.f32 %v239_v63, %v170_v51 }
 0x154   :  { %840 = vtanh.f32 %v211_v62 }
 0x155   :  { %842 = vtanh.f32 %v240_v1 }
 0x156   :  { %844 = vtanh.f32 %v208_v61  ;;  %v372_v61 = vpop.permute.xlu2 %371 }
 0x157   :  { %846 = vtanh.f32 %v237_v0 }
 0x158   :  { %848 = vtanh.f32 %v205_v4 }
 0x159   :  { %850 = vtanh.f32 %v234_v7 }
 0x15a   :  { %v1061_v12 = vpop.eup %840  ;;  %v368_v1 = vpop.permute.xlu1 %367 }
 0x15b   :  { %v1063_v13 = vpop.eup %842  ;;  %303 = vmatpush.msrb.mxu0 %v1061_v12 }
 0x15c   :  { %v1066_v14 = vpop.eup %844  ;;  %332 = vmatpush.msrb.mxu1 %v1063_v13 }
 0x15d   :  { %v1069_v15 = vpop.eup %846  ;;  %304 = vmatpush.msrb.mxu0 %v1066_v14 }
 0x15e   :  { %v1072_v16 = vpop.eup %848  ;;  %333 = vmatpush.msrb.mxu1 %v1069_v15  ;;  %v364_v7 = vpop.permute.xlu2 %363 }
 0x15f   :  { %v1075_v17 = vpop.eup %850  ;;  %305 = vmatpush.msrb.mxu0 %v1072_v16 }
 0x160   :  { %334 = vmatpush.msrb.mxu1 %v1075_v17 }
 0x161   :  { %306 = vmatpush.msrb.mxu0 %v1079_v18 }
 0x162   :  { %335 = vmatpush.msrb.mxu1 %v1083_v20  ;;  %760 = vmatmul.msk.f32.vlgmr.msrb.gmra.mxu0 %vm72_vm1, %v259_v19 }
 0x163   :  { %764 = vmatmul.msk.f32.vlgmr.msrb.gmra.mxu1 %vm72_vm1, %v259_v19 }
 0x16a   :  { %761 = vmatmul.msk.f32.gmra.mxu0 %vm72_vm1, %v260_v21 }
 0x16b   :  { %765 = vmatmul.msk.f32.gmra.mxu1 %vm72_vm1, %v260_v21 }
 0x172   :  { %762 = vmatmul.msk.f32.gmra.mxu0 %vm72_vm1, %v261_v9 }
 0x173   :  { %766 = vmatmul.msk.f32.gmra.mxu1 %vm72_vm1, %v261_v9 }
 0x17a   :  { %763 = vmatmul.msk.f32.gmra.mxu0 %vm72_vm1, %v262_v10 }
 0x17b   :  { %767 = vmatmul.msk.f32.gmra.mxu1 %vm72_vm1, %v262_v10 }
 0x1df   :  { %v308_v22 = vpop.f32.mrf.mxu0 }
 0x1e0   :  { %v337_v23 = vpop.f32.mrf.mxu1  ;;  %v309_v41 = vadd.f32 %v308_v22, %v265_v38 }
 0x1e1   :  { %v338_v42 = vadd.f32 %v337_v23, %v265_v38 }
 0x1e7   :  { %v311_v24 = vpop.f32.mrf.mxu0 }
 0x1e8   :  { %v340_v25 = vpop.f32.mrf.mxu1  ;;  %v312_v39 = vadd.f32 %v311_v24, %v269_v32 }
 0x1e9   :  { %v341_v40 = vadd.f32 %v340_v25, %v269_v32 }
 0x1ef   :  { %v314_v27 = vpop.f32.mrf.mxu0 }
 0x1f0   :  { %v343_v28 = vpop.f32.mrf.mxu1  ;;  %v315_v33 = vadd.f32 %v314_v27, %v273_v30 }
 0x1f1   :  { %v344_v36 = vadd.f32 %v343_v28, %v273_v30 }
 0x1f7   :  { %v317_v31 = vpop.f32.mrf.mxu0 }
 0x1f8   :  { %v318_v34 = vadd.f32 %v317_v31, %v277_v26  ;;  %v346_v35 = vpop.f32.mrf.mxu1 }
 0x1f9   :  { %v347_v37 = vadd.f32 %v346_v35, %v277_v26 }
 0x1fa   :  { %852 = vtanh.f32 %v318_v34 }
 0x1fb   :  { %854 = vtanh.f32 %v347_v37 }
 0x1fc   :  { %856 = vtanh.f32 %v315_v33 }
 0x1fd   :  { %858 = vtanh.f32 %v344_v36  ;;  %v465_v36 = vld [vmem:[#allocation2 + $0x80] sm:$0xff] }
 0x1fe   :  { %860 = vtanh.f32 %v312_v39 }
 0x1ff   :  { %862 = vtanh.f32 %v341_v40 }
 0x200   :  { %v853_v43 = vpop.eup %852  ;;  %864 = vtanh.f32 %v309_v41  ;;  %v479_v41 = vpop.permute.xlu1 %478 }
 0x201   :  { %v855_v44 = vpop.eup %854  ;;  %866 = vtanh.f32 %v338_v42  ;;  %402 = vmatpush.msrb.mxu2 %v853_v43  ;;  %v483_v43 = vpop.permute.xlu0 %482 }
 0x202   :  { %v857_v45 = vpop.eup %856  ;;  %431 = vmatpush.msrb.mxu3 %v855_v44 }
 0x203   :  { %v859_v46 = vpop.eup %858  ;;  %403 = vmatpush.msrb.mxu2 %v857_v45  ;;  %v475_v45 = vpop.permute.xlu2 %474 }
 0x204   :  { %v861_v47 = vpop.eup %860  ;;  %432 = vmatpush.msrb.mxu3 %v859_v46 }
 0x205   :  { %v863_v48 = vpop.eup %862  ;;  %404 = vmatpush.msrb.mxu2 %v861_v47 }
 0x206   :  { %v865_v50 = vpop.eup %864  ;;  %433 = vmatpush.msrb.mxu3 %v863_v48 }
 0x207   :  { %v867_v51 = vpop.eup %866  ;;  %405 = vmatpush.msrb.mxu2 %v865_v50 }
 0x208   :  { %434 = vmatpush.msrb.mxu3 %v867_v51  ;;  %768 = vmatmul.msk.f32.vlgmr.msrb.gmra.mxu2 %vm72_vm1, %v358_v49  ;;  %v471_v51 = vpop.permute.xlu1 %470 }
 0x209   :  { %772 = vmatmul.msk.f32.vlgmr.msrb.gmra.mxu3 %vm72_vm1, %v358_v49 }
 0x210   :  { %769 = vmatmul.msk.f32.gmra.mxu2 %vm72_vm1, %v359_v52 }
 0x211   :  { %773 = vmatmul.msk.f32.gmra.mxu3 %vm72_vm1, %v359_v52 }
 0x218   :  { %770 = vmatmul.msk.f32.gmra.mxu2 %vm72_vm1, %v360_v53 }
 0x219   :  { %774 = vmatmul.msk.f32.gmra.mxu3 %vm72_vm1, %v360_v53  ;;  %v976_v53 = vmov 5  }
 0x21a   :  { %819 = vset.pattern.permute.xlu1 %v976_v53  ;;  %817 = vset.pattern.permute.xlu2 %v976_v53 }
 0x21b   :  { %573 = vperm.xlu1 %819, %v1012_v2   ;;  %818 = vset.pattern.permute.xlu0 %v976_v53 }
 0x21c   :  { %581 = vperm.xlu2 %817, %v1018_v3   ;;  %577 = vperm.xlu0 %818, %v1029_v6   ;;  %v564_v6 = vld [vmem:[#allocation2 + $0xa0] sm:$0xff] }
 0x220   :  { %771 = vmatmul.msk.f32.gmra.mxu2 %vm72_vm1, %v361_v54 }
 0x221   :  { %775 = vmatmul.msk.f32.gmra.mxu3 %vm72_vm1, %v361_v54 }
 0x224   :  { %569 = vperm.xlu2 %817, %v1024_v5   ;;  %v567_v5 = vld [vmem:[#allocation2 + $0xb8] sm:$0xff] }
 0x28b   :  { %v407_v55 = vpop.f32.mrf.mxu2 }
 0x28c   :  { %v436_v56 = vpop.f32.mrf.mxu3  ;;  %v408_v22 = vadd.f32 %v407_v55, %v364_v7 }
 0x28d   :  { %v437_v23 = vadd.f32 %v436_v56, %v364_v7 }
 0x293   :  { %v410_v57 = vpop.f32.mrf.mxu2 }
 0x294   :  { %v439_v58 = vpop.f32.mrf.mxu3  ;;  %v411_v11 = vadd.f32 %v410_v57, %v368_v1 }
 0x295   :  { %v440_v9 = vadd.f32 %v439_v58, %v368_v1 }
 0x29b   :  { %v413_v62 = vpop.f32.mrf.mxu2 }
 0x29c   :  { %v442_v63 = vpop.f32.mrf.mxu3  ;;  %v414_v0 = vadd.f32 %v413_v62, %v372_v61 }
 0x29d   :  { %v443_v4 = vadd.f32 %v442_v63, %v372_v61  ;;  %v565_v63 = vld [vmem:[#allocation2 + $0xa8] sm:$0xff] }
 0x29e   :  { %868 = vtanh.f32 %v414_v0  ;;  %v566_v0 = vld [vmem:[#allocation2 + $0xb0] sm:$0xff] }
 0x29f   :  { %870 = vtanh.f32 %v443_v4 }
 0x2a3   :  { %v416_v8 = vpop.f32.mrf.mxu2 }
 0x2a4   :  { %v417_v19 = vadd.f32 %v416_v8, %v376_v59  ;;  %v445_v21 = vpop.f32.mrf.mxu3  ;;  %v869_v24 = vpop.eup %868 }
 0x2a5   :  { %v446_v10 = vadd.f32 %v445_v21, %v376_v59  ;;  %v871_v25 = vpop.eup %870  ;;  %v1119_v32 = vadd.f32 %v869_v24, %v1066_v14 }
 0x2a6   :  { %872 = vtanh.f32 %v417_v19  ;;  %v1123_v34 = vadd.f32 %v871_v25, %v1069_v15 }
 0x2a7   :  { %874 = vtanh.f32 %v446_v10 }
 0x2a8   :  { %876 = vtanh.f32 %v411_v11  ;;  %v582_v11 = vpop.permute.xlu2 %581 }
 0x2a9   :  { %878 = vtanh.f32 %v440_v9  ;;  %v578_v9 = vpop.permute.xlu0 %577 }
 0x2aa   :  { %880 = vtanh.f32 %v408_v22  ;;  %v574_v22 = vpop.permute.xlu1 %573 }
 0x2ab   :  { %882 = vtanh.f32 %v437_v23 }
 0x2ac   :  { %v873_v26 = vpop.eup %872 }
 0x2ad   :  { %v875_v27 = vpop.eup %874  ;;  %v1112_v28 = vadd.f32 %v873_v26, %v1061_v12 }
 0x2ae   :  { %v877_v29 = vpop.eup %876  ;;  %v1115_v30 = vadd.f32 %v875_v27, %v1063_v13 }
 0x2af   :  { %v879_v31 = vpop.eup %878  ;;  %509 = vmatpush.msra.mxu0 %v1112_v28  ;;  %v1127_v12 = vadd.f32 %v877_v29, %v1072_v16  ;;  %v466_v16 = vld [vmem:[#allocation2 + $0x88] sm:$0xff] }
 0x2b0   :  { %v881_v33 = vpop.eup %880  ;;  %538 = vmatpush.msra.mxu1 %v1115_v30  ;;  %v1131_v13 = vadd.f32 %v879_v31, %v1075_v17  ;;  %v467_v17 = vld [vmem:[#allocation2 + $0x90] sm:$0xff]  ;;  %v570_v24 = vpop.permute.xlu2 %569 }
 0x2b1   :  { %v883_v35 = vpop.eup %882  ;;  %510 = vmatpush.msra.mxu0 %v1119_v32  ;;  %v1135_v14 = vadd.f32 %v881_v33, %v1079_v18  ;;  %v468_v18 = vld [vmem:[#allocation2 + $0x98] sm:$0xff] }
 0x2b2   :  { %539 = vmatpush.msra.mxu1 %v1123_v34  ;;  %v1139_v15 = vadd.f32 %v883_v35, %v1083_v20 }
 0x2b3   :  { %511 = vmatpush.msra.mxu0 %v1127_v12 }
 0x2b4   :  { %540 = vmatpush.msra.mxu1 %v1131_v13 }
 0x2b5   :  { %512 = vmatpush.msra.mxu0 %v1135_v14 }
 0x2b6   :  { %541 = vmatpush.msra.mxu1 %v1139_v15  ;;  %776 = vmatmul.msk.f32.vlgmr.msra.gmra.mxu0 %vm72_vm1, %v465_v36 }
 0x2b7   :  { %780 = vmatmul.msk.f32.vlgmr.msra.gmra.mxu1 %vm72_vm1, %v465_v36 }
 0x2be   :  { %777 = vmatmul.msk.f32.gmra.mxu0 %vm72_vm1, %v466_v16 }
 0x2bf   :  { %781 = vmatmul.msk.f32.gmra.mxu1 %vm72_vm1, %v466_v16 }
 0x2c6   :  { %778 = vmatmul.msk.f32.gmra.mxu0 %vm72_vm1, %v467_v17 }
 0x2c7   :  { %782 = vmatmul.msk.f32.gmra.mxu1 %vm72_vm1, %v467_v17 }
 0x2ce   :  { %779 = vmatmul.msk.f32.gmra.mxu0 %vm72_vm1, %v468_v18 }
 0x2cf   :  { %783 = vmatmul.msk.f32.gmra.mxu1 %vm72_vm1, %v468_v18 }
 0x333   :  { %v514_v20 = vpop.f32.mrf.mxu0 }
 0x334   :  { %v543_v37 = vpop.f32.mrf.mxu1  ;;  %v515_v55 = vadd.f32 %v514_v20, %v471_v51 }
 0x335   :  { %v544_v56 = vadd.f32 %v543_v37, %v471_v51 }
 0x33b   :  { %v517_v38 = vpop.f32.mrf.mxu0 }
 0x33c   :  { %v546_v39 = vpop.f32.mrf.mxu1  ;;  %v518_v52 = vadd.f32 %v517_v38, %v475_v45 }
 0x33d   :  { %v547_v54 = vadd.f32 %v546_v39, %v475_v45 }
 0x343   :  { %v520_v40 = vpop.f32.mrf.mxu0 }
 0x344   :  { %v549_v42 = vpop.f32.mrf.mxu1  ;;  %v521_v46 = vadd.f32 %v520_v40, %v479_v41 }
 0x345   :  { %v550_v49 = vadd.f32 %v549_v42, %v479_v41 }
 0x34b   :  { %v523_v44 = vpop.f32.mrf.mxu0 }
 0x34c   :  { %v524_v47 = vadd.f32 %v523_v44, %v483_v43  ;;  %v552_v48 = vpop.f32.mrf.mxu1 }
 0x34d   :  { %v553_v50 = vadd.f32 %v552_v48, %v483_v43 }
 0x34e   :  { %884 = vtanh.f32 %v524_v47 }
 0x34f   :  { %886 = vtanh.f32 %v553_v50 }
 0x350   :  { %888 = vtanh.f32 %v521_v46 }
 0x351   :  { %890 = vtanh.f32 %v550_v49 }
 0x352   :  { %892 = vtanh.f32 %v518_v52 }
 0x353   :  { %894 = vtanh.f32 %v547_v54 }
 0x354   :  { %v885_v57 = vpop.eup %884  ;;  %896 = vtanh.f32 %v515_v55 }
 0x355   :  { %v887_v58 = vpop.eup %886  ;;  %898 = vtanh.f32 %v544_v56  ;;  %608 = vmatpush.msra.mxu2 %v885_v57 }
 0x356   :  { %v889_v59 = vpop.eup %888  ;;  %637 = vmatpush.msra.mxu3 %v887_v58 }
 0x357   :  { %v891_v60 = vpop.eup %890  ;;  %609 = vmatpush.msra.mxu2 %v889_v59 }
 0x358   :  { %v893_v2 = vpop.eup %892  ;;  %638 = vmatpush.msra.mxu3 %v891_v60 }
 0x359   :  { %v895_v3 = vpop.eup %894  ;;  %610 = vmatpush.msra.mxu2 %v893_v2 }
 0x35a   :  { %v897_v61 = vpop.eup %896  ;;  %639 = vmatpush.msra.mxu3 %v895_v3 }
 0x35b   :  { %v899_v62 = vpop.eup %898  ;;  %611 = vmatpush.msra.mxu2 %v897_v61 }
 0x35c   :  { %640 = vmatpush.msra.mxu3 %v899_v62  ;;  %784 = vmatmul.msk.f32.vlgmr.msra.gmra.mxu2 %vm72_vm1, %v564_v6 }
 0x35d   :  { %788 = vmatmul.msk.f32.vlgmr.msra.gmra.mxu3 %vm72_vm1, %v564_v6 }
 0x364   :  { %785 = vmatmul.msk.f32.gmra.mxu2 %vm72_vm1, %v565_v63 }
 0x365   :  { %789 = vmatmul.msk.f32.gmra.mxu3 %vm72_vm1, %v565_v63 }
 0x36c   :  { %786 = vmatmul.msk.f32.gmra.mxu2 %vm72_vm1, %v566_v0 }
 0x36d   :  { %790 = vmatmul.msk.f32.gmra.mxu3 %vm72_vm1, %v566_v0 }
 0x374   :  { %787 = vmatmul.msk.f32.gmra.mxu2 %vm72_vm1, %v567_v5 }
 0x375   :  { %791 = vmatmul.msk.f32.gmra.mxu3 %vm72_vm1, %v567_v5 }
 0x3df   :  { %v613_v1 = vpop.f32.mrf.mxu2 }
 0x3e0   :  { %v642_v4 = vpop.f32.mrf.mxu3  ;;  %v614_v35 = vadd.f32 %v613_v1, %v570_v24 }
 0x3e1   :  { %v643_v36 = vadd.f32 %v642_v4, %v570_v24 }
 0x3e7   :  { %v616_v7 = vpop.f32.mrf.mxu2 }
 0x3e8   :  { %v645_v8 = vpop.f32.mrf.mxu3  ;;  %v617_v26 = vadd.f32 %v616_v7, %v574_v22 }
 0x3e9   :  { %v646_v31 = vadd.f32 %v645_v8, %v574_v22 }
 0x3ef   :  { %v619_v19 = vpop.f32.mrf.mxu2 }
 0x3f0   :  { %v648_v21 = vpop.f32.mrf.mxu3  ;;  %v620_v10 = vadd.f32 %v619_v19, %v578_v9 }
 0x3f1   :  { %v649_v23 = vadd.f32 %v648_v21, %v578_v9 }
 0x3f2   :  { %900 = vtanh.f32 %v620_v10 }
 0x3f3   :  { %902 = vtanh.f32 %v649_v23 }
 0x3f7   :  { %v622_v25 = vpop.f32.mrf.mxu2 }
 0x3f8   :  { %v623_v27 = vadd.f32 %v622_v25, %v582_v11  ;;  %v651_v29 = vpop.f32.mrf.mxu3  ;;  %v901_v16 = vpop.eup %900 }
 0x3f9   :  { %v652_v33 = vadd.f32 %v651_v29, %v582_v11  ;;  %v903_v17 = vpop.eup %902  ;;  %v666_v41 = vadd.f32 %v901_v16, %v1119_v32  ;;  %v670_v32 = vld [vmem:[%s1182_s3] sm:$0x1] }
 0x3fa   :  { %904 = vtanh.f32 %v623_v27  ;;  %v667_v43 = vadd.f32 %v903_v17, %v1123_v34  ;;  %v720_v34 = vlaneseq }
 0x3fb   :  { %906 = vtanh.f32 %v652_v33 }
 0x3fc   :  { %908 = vtanh.f32 %v617_v26  ;;  %vm722_vm3 = vcmp.lt.s32.totalorder %v720_v34, 256 }
 0x3fd   :  { %910 = vtanh.f32 %v646_v31 }
 0x3fe   :  { %912 = vtanh.f32 %v614_v35 }
 0x3ff   :  { %914 = vtanh.f32 %v643_v36 }
 0x400   :  { %v905_v18 = vpop.eup %904 }
 0x401   :  { %v907_v20 = vpop.eup %906  ;;  %v668_v37 = vadd.f32 %v905_v18, %v1112_v28 }
 0x402   :  { %v909_v38 = vpop.eup %908  ;;  %v669_v39 = vadd.f32 %v907_v20, %v1115_v30 }
 0x403   :  { %v911_v40 = vpop.eup %910  ;;  %686 = vmatpush.msrb.mxu0 %v668_v37  ;;  %v664_v45 = vadd.f32 %v909_v38, %v1127_v12 }
 0x404   :  { %v913_v42 = vpop.eup %912  ;;  %706 = vmatpush.msrb.mxu1 %v669_v39  ;;  %v665_v46 = vadd.f32 %v911_v40, %v1131_v13 }
 0x405   :  { %v915_v44 = vpop.eup %914  ;;  %687 = vmatpush.msrb.mxu0 %v666_v41  ;;  %v662_v28 = vadd.f32 %v913_v42, %v1135_v14 }
 0x406   :  { %707 = vmatpush.msrb.mxu1 %v667_v43  ;;  %v663_v30 = vadd.f32 %v915_v44, %v1139_v15 }
 0x407   :  { %688 = vmatpush.msrb.mxu0 %v664_v45 }
 0x408   :  { %708 = vmatpush.msrb.mxu1 %v665_v46 }
 0x409   :  { %689 = vmatpush.msrb.mxu0 %v662_v28 }
 0x40a   :  { %709 = vmatpush.msrb.mxu1 %v663_v30  ;;  %792 = vmatmul.msk.f32.vlgmr.msrb.gmra.mxu0 %vm72_vm1, %v670_v32 }
 0x40b   :  { %793 = vmatmul.msk.f32.vlgmr.msrb.gmra.mxu1 %vm72_vm1, %v670_v32 }
 0x487   :  { %v691_v13 = vpop.f32.mrf.mxu0 }
 0x488   :  { %v711_v12 = vpop.f32.mrf.mxu1 }
 0x489   :  { %v716_v14 = vrot.slane %v711_v12, 7 }
 0x48b   :  { %v718_v15 = vsel %vm717_vm2, %v691_v13, %v716_v14 }
 0x48c   :  { %724 = vst.msk [vmem:[#allocation5] sm:$0x3] %vm722_vm3, %v718_v15 }
 0x48d   :  { %735 = dma.vmem_to_hbm [thread:$0]  %s731_s6, 32, %s733_s9, [#allocation4]  }
 0x48e   :  { %966 = dma.done.wait [#allocation4], 32  }
 0x48f   :  { %967 = vsyncadd [#allocation4], 4294967264 }
 0x490   :  { %740 = vsyncpa [#allocation3], 1 }
 0x491   :  { %741 = vsyncpa [#allocation4], 1 }

</bundles_post_ra>
